<compile_context>
chip_gen: v6e
topology: v6e:2x2x1
jax: 0.10.0
libtpu: 0.0.40
codegen_flags: <defaults>
</compile_context>

<pallas_src>
import functools
import math

import numpy as np
import jax
import jax.numpy as jnp
from jax.experimental import pallas as pl
from jax.experimental.pallas import tpu as pltpu


_VMEM_LIMIT = 64 * 1024 * 1024      # raise scoped-VMEM cap (defaults 16/32 MiB)


def _cparams(*sem):
    if not sem:
        sem = ("parallel",)
    return pltpu.CompilerParams(dimension_semantics=sem,
                                vmem_limit_bytes=_VMEM_LIMIT)


def _block_m(M, cap=512):
    # 512-row tiles keep the mem-bound row kernels near the HBM roofline while
    # fitting v7x's 64 MiB VMEM (v5e/v6e could go to 1024).
    return M if M <= cap else cap


# ----------------------------- in-kernel helpers ----------------------------

def _gelu(x):
    # TODO(synk): tanh-form GELU (PyTorch F.gelu default is exact erf); ~1e-3
    # deviation, chosen so the transcendental runs on the EUP slot.
    c = math.sqrt(2.0 / math.pi)
    return 0.5 * x * (1.0 + jnp.tanh(c * (x + 0.044715 * x * x * x)))


def _layernorm(x, g, b):
    mu = jnp.mean(x, axis=-1, keepdims=True)
    var = jnp.mean(jnp.square(x - mu), axis=-1, keepdims=True)
    return (x - mu) * jax.lax.rsqrt(var + 1e-5) * g + b


# ----------------------------- row kernels ----------------------------------

def _linear_kernel(x_ref, w_ref, b_ref, o_ref):
    x = x_ref[...].astype(jnp.bfloat16)
    o_ref[...] = (jnp.dot(x, w_ref[...], preferred_element_type=jnp.float32)
                  + b_ref[...]).astype(o_ref.dtype)


def pallas_linear(x, w, b, out_dtype=jnp.float32):
    """y = x @ w + b over the last axis. x (..., K), w (K, N) bf16, b (N,) f32."""
    orig = x.shape
    K = orig[-1]
    M = int(np.prod(orig[:-1]))
    N = w.shape[1]
    bm = _block_m(M)
    out = pl.pallas_call(
        _linear_kernel,
        out_shape=jax.ShapeDtypeStruct((M, N), out_dtype),
        grid=(pl.cdiv(M, bm),),
        in_specs=[pl.BlockSpec((bm, K), lambda i: (i, 0)),
                  pl.BlockSpec((K, N), lambda i: (0, 0)),
                  pl.BlockSpec((1, N), lambda i: (0, 0))],
        out_specs=pl.BlockSpec((bm, N), lambda i: (i, 0)),
        compiler_params=_cparams(),
    )(x.reshape(M, K), w, b.reshape(1, N))
    return out.reshape(orig[:-1] + (N,))


def _layernorm_kernel(x_ref, g_ref, b_ref, o_ref):
    o_ref[...] = _layernorm(x_ref[...].astype(jnp.float32), g_ref[...], b_ref[...])


def pallas_layernorm(x, g, b):
    orig = x.shape
    D = orig[-1]
    M = int(np.prod(orig[:-1]))
    bm = _block_m(M)
    out = pl.pallas_call(
        _layernorm_kernel,
        out_shape=jax.ShapeDtypeStruct((M, D), jnp.float32),
        grid=(pl.cdiv(M, bm),),
        in_specs=[pl.BlockSpec((bm, D), lambda i: (i, 0)),
                  pl.BlockSpec((1, D), lambda i: (0, 0)),
                  pl.BlockSpec((1, D), lambda i: (0, 0))],
        out_specs=pl.BlockSpec((bm, D), lambda i: (i, 0)),
        compiler_params=_cparams(),
    )(x.reshape(M, D), g.reshape(1, D), b.reshape(1, D))
    return out.reshape(orig)


def _proj_res_ln_kernel(x_ref, w_ref, b_ref, r_ref, g_ref, beta_ref, o_ref):
    x = x_ref[...].astype(jnp.bfloat16)
    h = (jnp.dot(x, w_ref[...], preferred_element_type=jnp.float32)
         + b_ref[...] + r_ref[...])
    o_ref[...] = _layernorm(h, g_ref[...], beta_ref[...])


def pallas_proj_residual_ln(x, w, b, res, g, beta):
    """LayerNorm(res + x @ w + b). x may be bf16 (attention head output)."""
    B, L, K = x.shape
    D = w.shape[1]
    M = B * L
    bm = _block_m(M)
    out = pl.pallas_call(
        _proj_res_ln_kernel,
        out_shape=jax.ShapeDtypeStruct((M, D), jnp.float32),
        grid=(pl.cdiv(M, bm),),
        in_specs=[pl.BlockSpec((bm, K), lambda i: (i, 0)),
                  pl.BlockSpec((K, D), lambda i: (0, 0)),
                  pl.BlockSpec((1, D), lambda i: (0, 0)),
                  pl.BlockSpec((bm, D), lambda i: (i, 0)),
                  pl.BlockSpec((1, D), lambda i: (0, 0)),
                  pl.BlockSpec((1, D), lambda i: (0, 0))],
        out_specs=pl.BlockSpec((bm, D), lambda i: (i, 0)),
        compiler_params=_cparams(),
    )(x.reshape(M, K), w, b.reshape(1, D),
      res.reshape(M, D).astype(jnp.float32), g.reshape(1, D), beta.reshape(1, D))
    return out.reshape(B, L, D)


def _ffn_res_ln_kernel(x_ref, w1_ref, b1_ref, w2_ref, b2_ref, g_ref, beta_ref,
                       o_ref, *, f_chunk):
    x = x_ref[...]                      # f32: residual base + matmul input
    xb = x.astype(jnp.bfloat16)
    F = w1_ref.shape[1]
    acc = x + b2_ref[...]
    # d_ff tiled so the live GELU chunk stays small (v5e single vst slot, v7x VMEM)
    for f0 in range(0, F, f_chunk):
        h = (jnp.dot(xb, w1_ref[:, f0:f0 + f_chunk],
                     preferred_element_type=jnp.float32)
             + b1_ref[:, f0:f0 + f_chunk])
        h = _gelu(h)
        acc = acc + jnp.dot(h.astype(jnp.bfloat16), w2_ref[f0:f0 + f_chunk, :],
                            preferred_element_type=jnp.float32)
    o_ref[...] = _layernorm(acc, g_ref[...], beta_ref[...])


def pallas_ffn_residual_ln(x, w1, b1, w2, b2, g, beta):
    """LayerNorm(x + gelu(x @ w1 + b1) @ w2 + b2)."""
    B, L, D = x.shape
    F = w1.shape[1]
    M = B * L
    bm = _block_m(M)
    f_chunk = F if F <= 1024 else 512
    if F % f_chunk:
        f_chunk = F
    out = pl.pallas_call(
        functools.partial(_ffn_res_ln_kernel, f_chunk=f_chunk),
        out_shape=jax.ShapeDtypeStruct((M, D), jnp.float32),
        grid=(pl.cdiv(M, bm),),
        in_specs=[pl.BlockSpec((bm, D), lambda i: (i, 0)),
                  pl.BlockSpec((D, F), lambda i: (0, 0)),
                  pl.BlockSpec((1, F), lambda i: (0, 0)),
                  pl.BlockSpec((F, D), lambda i: (0, 0)),
                  pl.BlockSpec((1, D), lambda i: (0, 0)),
                  pl.BlockSpec((1, D), lambda i: (0, 0)),
                  pl.BlockSpec((1, D), lambda i: (0, 0))],
        out_specs=pl.BlockSpec((bm, D), lambda i: (i, 0)),
        compiler_params=_cparams(),
    )(x.reshape(M, D).astype(jnp.float32), w1, b1.reshape(1, F), w2,
      b2.reshape(1, D), g.reshape(1, D), beta.reshape(1, D))
    return out.reshape(B, L, D)


# ----------------------------- flash attention kernel -----------------------

def _flash_init(m_sc, l_sc, acc_sc):
    m_sc[...] = jnp.full_like(m_sc, -1e30)
    l_sc[...] = jnp.zeros_like(l_sc)
    acc_sc[...] = jnp.zeros_like(acc_sc)


def _flash_step(s, v, m_sc, l_sc, acc_sc):
    m_prev = m_sc[...]
    m_new = jnp.maximum(m_prev, jnp.max(s, axis=-1, keepdims=True))
    alpha = jnp.exp(m_prev - m_new)
    p = jnp.exp(s - m_new)
    l_sc[...] = alpha * l_sc[...] + jnp.sum(p, axis=-1, keepdims=True)
    acc_sc[...] = alpha * acc_sc[...] + jnp.einsum(
        'gms,gsd->gmd', p.astype(jnp.bfloat16), v,
        preferred_element_type=jnp.float32)
    m_sc[...] = m_new


def _flash_finalize(o_ref, m_sc, l_sc, acc_sc):
    o_ref[...] = (acc_sc[...] *
                  pl.reciprocal(l_sc[...], approx=True)).astype(o_ref.dtype)


def _attn_kernel(q_ref, k_ref, v_ref, o_ref, m_sc, l_sc, acc_sc, *, scale):
    si = pl.program_id(1)

    @pl.when(si == 0)
    def _():
        _flash_init(m_sc, l_sc, acc_sc)

    s = jnp.einsum('gme,gse->gms', q_ref[...], k_ref[...],
                   preferred_element_type=jnp.float32) * scale
    _flash_step(s, v_ref[...], m_sc, l_sc, acc_sc)

    @pl.when(si == pl.num_programs(1) - 1)
    def _():
        _flash_finalize(o_ref, m_sc, l_sc, acc_sc)


def _attn_kernel_causal(qpos_ref, q_ref, k_ref, v_ref, o_ref,
                        m_sc, l_sc, acc_sc, *, scale, ts):
    si = pl.program_id(1)

    @pl.when(si == 0)
    def _():
        _flash_init(m_sc, l_sc, acc_sc)

    s = jnp.einsum('gme,gse->gms', q_ref[...], k_ref[...],
                   preferred_element_type=jnp.float32) * scale
    # causal mask built in-kernel: key position > query position => masked
    kpos = si * ts + jax.lax.broadcasted_iota(jnp.int32, s.shape, 2)
    s = jnp.where(kpos > qpos_ref[...], -1e30, s)
    _flash_step(s, v_ref[...], m_sc, l_sc, acc_sc)

    @pl.when(si == pl.num_programs(1) - 1)
    def _():
        _flash_finalize(o_ref, m_sc, l_sc, acc_sc)


def pallas_attention(q, k, v, scale, qpos=None):
    """softmax(scale * q @ k^T [causal to qpos]) @ v over G independent groups.
    q (G,M,E), k (G,S,E), v (G,S,Dv) bf16; qpos (G,M,1) int32 or None.
    Returns (G,M,Dv) bf16. Flash-style S tiling, G tiled for >= ~8 grid steps."""
    G, M, E = q.shape
    S = k.shape[1]
    Dv = v.shape[2]
    gb = max(1, G // 8)                 # aim for >= 8 G-steps (pipelining / 2 TCs)
    while G % gb:
        gb -= 1
    ts = S
    if S > 512 and S % 512 == 0:        # key tile; full-S fallback for ragged S
        ts = 512
    grid = (G // gb, pl.cdiv(S, ts))
    qb = q.astype(jnp.bfloat16)
    kb = k.astype(jnp.bfloat16)
    vb = v.astype(jnp.bfloat16)
    qkv_specs = [pl.BlockSpec((gb, M, E), lambda gi, si: (gi, 0, 0)),
                 pl.BlockSpec((gb, ts, E), lambda gi, si: (gi, si, 0)),
                 pl.BlockSpec((gb, ts, Dv), lambda gi, si: (gi, si, 0))]
    out_spec = pl.BlockSpec((gb, M, Dv), lambda gi, si: (gi, 0, 0))
    out_shape = jax.ShapeDtypeStruct((G, M, Dv), jnp.bfloat16)
    scratch = [pltpu.VMEM((gb, M, 1), jnp.float32),
               pltpu.VMEM((gb, M, 1), jnp.float32),
               pltpu.VMEM((gb, M, Dv), jnp.float32)]
    if qpos is None:
        return pl.pallas_call(
            functools.partial(_attn_kernel, scale=float(scale)),
            out_shape=out_shape, grid=grid,
            in_specs=qkv_specs, out_specs=out_spec, scratch_shapes=scratch,
            compiler_params=_cparams("parallel", "arbitrary"),
        )(qb, kb, vb)
    return pl.pallas_call(
        functools.partial(_attn_kernel_causal, scale=float(scale), ts=ts),
        out_shape=out_shape, grid=grid,
        in_specs=[pl.BlockSpec((gb, M, 1), lambda gi, si: (gi, 0, 0))] + qkv_specs,
        out_specs=out_spec, scratch_shapes=scratch,
        compiler_params=_cparams("parallel", "arbitrary"),
    )(qpos.astype(jnp.int32), qb, kb, vb)


# ----------------------------- conv / BN / ELU kernel -----------------------

def _conv_bn_elu_kernel(x_ref, w_ref, b_ref, g_ref, beta_ref, o_ref):
    x = x_ref[...]                                  # (B, L, D) f32, single DMA
    Bq, L, D = x.shape
    # circular t-1 / t+1 taps formed in-kernel (no 3x input DMA)
    prev = jnp.concatenate([x[:, L - 1:, :], x[:, :L - 1, :]], axis=1)
    nxt = jnp.concatenate([x[:, 1:, :], x[:, :1, :]], axis=1)
    w = w_ref[...]                                  # (3D, D) bf16
    y = (jnp.dot(prev.reshape(Bq * L, D).astype(jnp.bfloat16), w[0:D],
                 preferred_element_type=jnp.float32)
         + jnp.dot(x.reshape(Bq * L, D).astype(jnp.bfloat16), w[D:2 * D],
                   preferred_element_type=jnp.float32)
         + jnp.dot(nxt.reshape(Bq * L, D).astype(jnp.bfloat16), w[2 * D:3 * D],
                   preferred_element_type=jnp.float32)
         + b_ref[...])
    # BatchNorm1d (training-mode batch statistics, biased variance)
    mu = jnp.mean(y, axis=0, keepdims=True)
    var = jnp.mean(jnp.square(y - mu), axis=0, keepdims=True)
    y = (y - mu) * jax.lax.rsqrt(var + 1e-5) * g_ref[...] + beta_ref[...]
    # ELU
    y = jnp.where(y > 0.0, y, jnp.exp(jnp.minimum(y, 0.0)) - 1.0)
    o_ref[...] = y.reshape(Bq, L, D)


def conv_layer(p, x):
    # ConvLayer: circular Conv1d(k=3,pad=1) + BatchNorm1d + ELU fused;
    # MaxPool1d(3,2,1) as XLA glue.
    # TODO(synk): for very large B*L this single-block kernel should be M-tiled
    # with a two-pass (global) BatchNorm reduction to fit v7x's 64 MiB VMEM.
    B, L, D = x.shape
    y = pl.pallas_call(
        _conv_bn_elu_kernel,
        out_shape=jax.ShapeDtypeStruct((B, L, D), jnp.float32),
        grid=(1,),
        in_specs=[pl.BlockSpec((B, L, D), lambda i: (0, 0, 0)),
                  pl.BlockSpec((3 * D, D), lambda i: (0, 0)),
                  pl.BlockSpec((1, D), lambda i: (0, 0)),
                  pl.BlockSpec((1, D), lambda i: (0, 0)),
                  pl.BlockSpec((1, D), lambda i: (0, 0))],
        out_specs=pl.BlockSpec((B, L, D), lambda i: (0, 0, 0)),
        compiler_params=_cparams("arbitrary"),
    )(x.astype(jnp.float32), p['w'], p['b'].reshape(1, D),
      p['bn_g'].reshape(1, D), p['bn_b'].reshape(1, D))
    neg = jnp.full((B, 1, D), -jnp.inf, y.dtype)
    yp = jnp.concatenate([neg, y, neg], axis=1)                  # pad with -inf
    out_len = (L + 2 - 3) // 2 + 1
    idx = np.arange(out_len) * 2
    return jnp.maximum(jnp.maximum(yp[:, idx, :], yp[:, idx + 1, :]),
                       yp[:, idx + 2, :])


# ----------------------------- attention modules ----------------------------

def full_attention(q, k, v, mask_flag):
    # q,k,v: (B, L/S, H, E) bf16; returns (B, H, L, Dv) bf16
    B, L, H, E = q.shape
    S = k.shape[1]
    Dv = v.shape[-1]
    scale = 1.0 / math.sqrt(E)
    qh = jnp.transpose(q, (0, 2, 1, 3)).reshape(B * H, L, E)
    kh = jnp.transpose(k, (0, 2, 1, 3)).reshape(B * H, S, E)
    vh = jnp.transpose(v, (0, 2, 1, 3)).reshape(B * H, S, Dv)
    qpos = None
    if mask_flag:
        qpos = jnp.broadcast_to(
            jnp.arange(L, dtype=jnp.int32)[None, :, None], (B * H, L, 1))
    out = pallas_attention(qh, kh, vh, scale, qpos)
    return out.reshape(B, H, L, Dv)


def prob_attention(q, k, v, mask_flag, factor, rng_key):
    # ProbSparse attention. q,k,v: (B, L, H, E) bf16; returns (B, H, L_Q, Dv) bf16
    B, L_Q, H, E = q.shape
    L_K = k.shape[1]
    Dv = v.shape[-1]
    scale = 1.0 / math.sqrt(E)
    qh = jnp.transpose(q, (0, 2, 1, 3))   # (B,H,L_Q,E)
    kh = jnp.transpose(k, (0, 2, 1, 3))
    vh = jnp.transpose(v, (0, 2, 1, 3))

    U_part = min(int(factor * math.ceil(math.log(L_K))), L_K)
    u = min(int(factor * math.ceil(math.log(L_Q))), L_Q)

    # TODO(synk): torch.randint key sampling replaced by jax PRNG (same
    # algorithm, different RNG stream); the sampling gather + einsum stay as
    # XLA glue — moving them in-kernel via PrefetchScalarGridSpec is a further
    # HBM-traffic optimization at long L_K.
    index_sample = jax.random.randint(rng_key, (L_Q, U_part), 0, L_K)
    K_sample = kh[:, :, index_sample, :]                        # (B,H,L_Q,U,E)
    QK_sample = jnp.einsum('bhle,bhlue->bhlu', qh, K_sample,
                           preferred_element_type=jnp.float32)
    Mmeas = jnp.max(QK_sample, axis=-1) - jnp.sum(QK_sample, axis=-1) / L_K
    M_top = jax.lax.top_k(Mmeas, u)[1]                          # (B,H,u)

    b_idx = jnp.arange(B)[:, None, None]
    h_idx = jnp.arange(H)[None, :, None]
    Q_reduce = qh[b_idx, h_idx, M_top]                          # (B,H,u,E)

    G = B * H
    qpos = M_top.reshape(G, u, 1).astype(jnp.int32) if mask_flag else None
    ctx_top = pallas_attention(Q_reduce.reshape(G, u, E),
                               kh.reshape(G, L_K, E),
                               vh.reshape(G, L_K, Dv),
                               scale, qpos).reshape(B, H, u, Dv)

    if mask_flag:
        context = jnp.cumsum(vh.astype(jnp.float32), axis=2).astype(jnp.bfloat16)
    else:
        context = jnp.broadcast_to(
            jnp.mean(vh.astype(jnp.float32), axis=2, keepdims=True),
            (B, H, L_Q, Dv)).astype(jnp.bfloat16)
    context = context.at[b_idx, h_idx, M_top].set(ctx_top)
    return context                                              # (B,H,L_Q,Dv)


def attention_core(p, attn_fn, queries, keys, values, n_heads, mix):
    """Fused QKV projection (bf16 out) + inner attention; returns the
    pre-out-projection head output reshaped to (B, L, H*Dv) bf16."""
    B, L, _ = queries.shape
    S = keys.shape[1]
    H = n_heads
    d = p['wqkv'].shape[1] // 3
    if queries is keys:
        qkv = pallas_linear(queries, p['wqkv'], p['bqkv'],
                            out_dtype=jnp.bfloat16)             # (B,L,3d)
        q, k, v = qkv[..., :d], qkv[..., d:2 * d], qkv[..., 2 * d:]
    else:  # cross attention: fuse K/V projection, Q separately
        q = pallas_linear(queries, p['wqkv'][:, :d], p['bqkv'][:d],
                          out_dtype=jnp.bfloat16)
        kv = pallas_linear(keys, p['wqkv'][:, d:], p['bqkv'][d:],
                           out_dtype=jnp.bfloat16)
        k, v = kv[..., :d], kv[..., d:]
    q = q.reshape(B, L, H, -1)
    k = k.reshape(B, S, H, -1)
    v = v.reshape(B, S, H, -1)
    out = attn_fn(q, k, v)                              # (B, H, L, Dv) bf16
    if mix:
        # matches torch: out.transpose(2,1).contiguous().view(B,L,-1) — the
        # attention output is already (B,H,L,Dv), so this is a free reshape.
        return out.reshape(B, L, -1)
    return jnp.transpose(out, (0, 2, 1, 3)).reshape(B, L, -1)


# ----------------------------- encoder / decoder ----------------------------

def encoder_layer(p, x, cfg):
    attn_fn = lambda q, k, v: prob_attention(q, k, v, False, cfg['factor'],
                                             p['attn_key'])
    a = attention_core(p['attn'], attn_fn, x, x, x, cfg['n_heads'], mix=False)
    x = pallas_proj_residual_ln(a, p['attn']['wo'], p['attn']['bo'], x,
                                p['ln1_g'], p['ln1_b'])
    return pallas_ffn_residual_ln(x, p['w1'], p['b1'], p['w2'], p['b2'],
                                  p['ln2_g'], p['ln2_b'])


def run_encoder(p, x, cfg):
    # distil=True -> len(convs) == len(layers) - 1
    for i in range(len(p['convs'])):
        x = encoder_layer(p['layers'][i], x, cfg)
        x = conv_layer(p['convs'][i], x)
    x = encoder_layer(p['layers'][-1], x, cfg)
    return pallas_layernorm(x, p['norm_g'], p['norm_b'])


def run_encoder_stack(p_list, inp_lens, x, cfg):
    outs = []
    for i_len, pe_ in zip(inp_lens, p_list):
        inp_len = x.shape[1] // (2 ** i_len)
        outs.append(run_encoder(pe_, x[:, -inp_len:, :], cfg))
    return jnp.concatenate(outs, axis=1)


def decoder_layer(p, x, cross, cfg):
    self_fn = lambda q, k, v: prob_attention(q, k, v, True, cfg['factor'],
                                             p['self_key'])
    a = attention_core(p['self_attn'], self_fn, x, x, x, cfg['n_heads'],
                       mix=cfg['mix'])
    x = pallas_proj_residual_ln(a, p['self_attn']['wo'], p['self_attn']['bo'],
                                x, p['ln1_g'], p['ln1_b'])
    cross_fn = lambda q, k, v: full_attention(q, k, v, False)
    a = attention_core(p['cross_attn'], cross_fn, x, cross, cross,
                       cfg['n_heads'], mix=False)
    x = pallas_proj_residual_ln(a, p['cross_attn']['wo'],
                                p['cross_attn']['bo'], x,
                                p['ln2_g'], p['ln2_b'])
    return pallas_ffn_residual_ln(x, p['w1'], p['b1'], p['w2'], p['b2'],
                                  p['ln3_g'], p['ln3_b'])


def run_decoder(p, x, cross, cfg):
    for lp in p['layers']:
        x = decoder_layer(lp, x, cross, cfg)
    return pallas_layernorm(x, p['norm_g'], p['norm_b'])


# ----------------------------- embeddings -----------------------------------

def _sinusoid_table(n_pos, d_model):
    w = np.zeros((n_pos, d_model), np.float32)
    position = np.arange(n_pos, dtype=np.float32)[:, None]
    div_term = np.exp(np.arange(0, d_model, 2, dtype=np.float32)
                      * -(math.log(10000.0) / d_model))
    w[:, 0::2] = np.sin(position * div_term)
    w[:, 1::2] = np.cos(position * div_term)
    return jnp.asarray(w, jnp.float32)


def data_embedding(p, x, x_mark, pe):
    # TokenEmbedding: circular Conv1d(c_in->d_model,k=3,pad=1) via im2col+matmul
    B, L, _ = x.shape
    xc = jnp.concatenate([jnp.roll(x, 1, axis=1), x, jnp.roll(x, -1, axis=1)],
                         axis=-1)                               # (B,L,3*c_in)
    val = pallas_linear(xc, p['tok_w'], p['tok_b'])             # (B,L,d_model)
    pos = pe[:L][None]                                          # positional
    # TemporalEmbedding (embed='fixed', freq='h'): x_mark = [month,day,weekday,hour]
    month = p['month_tab'][x_mark[:, :, 0]]
    day = p['day_tab'][x_mark[:, :, 1]]
    weekday = p['weekday_tab'][x_mark[:, :, 2]]
    hour = p['hour_tab'][x_mark[:, :, 3]]
    return val + pos + (hour + weekday + day + month)           # dropout p=0.0


# ----------------------------- parameter init -------------------------------

class KeyGen:
    def __init__(self, key):
        self.key = key

    def __call__(self):
        self.key, sub = jax.random.split(self.key)
        return sub


def init_params(cfg, key):
    kg = KeyGen(key)
    d_model, d_ff, n_heads = cfg['d_model'], cfg['d_ff'], cfg['n_heads']

    def linear_p(d_in, d_out):
        # matmul weights stored in bf16 (halves weight DMA / resident VMEM)
        w = (jax.random.normal(kg(), (d_in, d_out), jnp.float32)
             / np.sqrt(d_in)).astype(jnp.bfloat16)
        b = jax.random.normal(kg(), (d_out,), jnp.float32) * 0.02
        return w, b

    def attn_p():
        dk = d_model // n_heads
        p = {}
        p['wqkv'], p['bqkv'] = linear_p(d_model, 3 * dk * n_heads)
        p['wo'], p['bo'] = linear_p(dk * n_heads, d_model)
        return p

    def enc_layer_p():
        p = {'attn': attn_p(), 'attn_key': kg()}
        p['w1'], p['b1'] = linear_p(d_model, d_ff)
        p['w2'], p['b2'] = linear_p(d_ff, d_model)
        for n in ('ln1', 'ln2'):
            p[n + '_g'] = jnp.ones((d_model,), jnp.float32)
            p[n + '_b'] = jnp.zeros((d_model,), jnp.float32)
        return p

    def conv_layer_p():
        p = {}
        p['w'], p['b'] = linear_p(3 * d_model, d_model)
        p['bn_g'] = jnp.ones((d_model,), jnp.float32)
        p['bn_b'] = jnp.zeros((d_model,), jnp.float32)
        return p

    def encoder_p(el):
        return {'layers': [enc_layer_p() for _ in range(el)],
                'convs': [conv_layer_p() for _ in range(el - 1)],
                'norm_g': jnp.ones((d_model,), jnp.float32),
                'norm_b': jnp.zeros((d_model,), jnp.float32)}

    def dec_layer_p():
        p = {'self_attn': attn_p(), 'self_key': kg(), 'cross_attn': attn_p()}
        p['w1'], p['b1'] = linear_p(d_model, d_ff)
        p['w2'], p['b2'] = linear_p(d_ff, d_model)
        for n in ('ln1', 'ln2', 'ln3'):
            p[n + '_g'] = jnp.ones((d_model,), jnp.float32)
            p[n + '_b'] = jnp.zeros((d_model,), jnp.float32)
        return p

    def embedding_p(c_in):
        p = {}
        p['tok_w'], p['tok_b'] = linear_p(3 * c_in, d_model)
        p['month_tab'] = _sinusoid_table(13, d_model)
        p['day_tab'] = _sinusoid_table(32, d_model)
        p['weekday_tab'] = _sinusoid_table(7, d_model)
        p['hour_tab'] = _sinusoid_table(24, d_model)
        return p

    params = {
        'enc_emb': embedding_p(cfg['enc_in']),
        'dec_emb': embedding_p(cfg['dec_in']),
        'pe': _sinusoid_table(5000, d_model),
        'encoders': [encoder_p(el) for el in cfg['e_layers']],
        'decoder': {'layers': [dec_layer_p() for _ in range(cfg['d_layers'])],
                    'norm_g': jnp.ones((d_model,), jnp.float32),
                    'norm_b': jnp.zeros((d_model,), jnp.float32)},
    }
    params['proj_w'], params['proj_b'] = linear_p(d_model, cfg['c_out'])
    return params


# ----------------------------- full forward ---------------------------------

def informer_stack_forward(params, cfg, x_enc, x_mark_enc, x_dec, x_mark_dec):
    enc_out = data_embedding(params['enc_emb'], x_enc, x_mark_enc, params['pe'])
    enc_out = run_encoder_stack(params['encoders'], cfg['inp_lens'], enc_out, cfg)
    dec_out = data_embedding(params['dec_emb'], x_dec, x_mark_dec, params['pe'])
    dec_out = run_decoder(params['decoder'], dec_out, enc_out, cfg)
    dec_out = pallas_linear(dec_out, params['proj_w'], params['proj_b'])
    return dec_out[:, -cfg['pred_len']:, :]


# ----------------------------- main ------------------------------------------

if __name__ == "__main__":
    cfg = dict(enc_in=4, dec_in=4, c_out=4,
               seq_len=16, label_len=8, pred_len=8,
               factor=5, d_model=32, n_heads=4,
               e_layers=[2, 1], d_layers=1, d_ff=64, mix=True)
    cfg['inp_lens'] = list(range(len(cfg['e_layers'])))

    root = jax.random.PRNGKey(0)
    pkey, dkey = jax.random.split(root)
    params = init_params(cfg, pkey)

    B = 2
    k1, k2, k3, k4 = jax.random.split(dkey, 4)
    L_dec = cfg['label_len'] + cfg['pred_len']
    x_enc = jax.random.normal(k1, (B, cfg['seq_len'], cfg['enc_in']), jnp.float32)
    x_dec = jax.random.normal(k2, (B, L_dec, cfg['dec_in']), jnp.float32)

    def make_mark(key, L):
        km, kd, kw, kh = jax.random.split(key, 4)
        return jnp.stack([jax.random.randint(km, (B, L), 1, 13),   # month
                          jax.random.randint(kd, (B, L), 1, 32),   # day
                          jax.random.randint(kw, (B, L), 0, 7),    # weekday
                          jax.random.randint(kh, (B, L), 0, 24)],  # hour
                         axis=-1)

    x_mark_enc = make_mark(k3, cfg['seq_len'])
    x_mark_dec = make_mark(k4, L_dec)

    out = informer_stack_forward(params, cfg, x_enc, x_mark_enc,
                                 x_dec, x_mark_dec)
    out = jax.block_until_ready(out)
    assert out.shape == (B, cfg['pred_len'], cfg['c_out']), out.shape
    assert bool(jnp.all(jnp.isfinite(out)))
    print("KERNEL_OK")
</pallas_src>

<mosaic_0001>
module attributes {stable_mosaic.version = 11 : i64} {
  func.func @_linear_kernel(%arg0: i32, %arg1: memref<32x12xf32, #tpu.memory_space<vmem>>, %arg2: memref<12x32xbf16, #tpu.memory_space<vmem>>, %arg3: memref<1x32xf32, #tpu.memory_space<vmem>>, %arg4: memref<32x32xf32, #tpu.memory_space<vmem>>) attributes {dimension_semantics = [#tpu.dimension_semantics<parallel>], iteration_bounds = array<i64: 1>, scalar_prefetch = 0 : i64, scratch_operands = 0 : i64, tpu.core_type = #tpu.core_type<tc>, window_params = [{transform_indices = @transform_0, window_bounds = array<i64: 32, 12>}, {pipeline_mode = #tpu.pipeline_mode<synchronous>, transform_indices = @transform_1, window_bounds = array<i64: 12, 32>}, {pipeline_mode = #tpu.pipeline_mode<synchronous>, transform_indices = @transform_2, window_bounds = array<i64: 1, 32>}, {transform_indices = @transform_3, window_bounds = array<i64: 32, 32>}]} {
    %c0 = arith.constant 0 : index
    %c0_0 = arith.constant 0 : index
    %0 = vector.load %arg1[%c0, %c0_0] : memref<32x12xf32, #tpu.memory_space<vmem>>, vector<32x12xf32>
    %1 = arith.truncf %0 : vector<32x12xf32> to vector<32x12xbf16>
    %c0_1 = arith.constant 0 : index
    %c0_2 = arith.constant 0 : index
    %2 = vector.load %arg2[%c0_1, %c0_2] : memref<12x32xbf16, #tpu.memory_space<vmem>>, vector<12x32xbf16>
    %cst = arith.constant dense<0.000000e+00> : vector<32x32xf32>
    %3 = tpu.matmul %1, %2, %cst {dimension_numbers = #tpu.dot_dimension_numbers<[1], [0], [0], [1], [0, 0, 1, 1], [], []>} : vector<32x12xbf16>, vector<12x32xbf16>, vector<32x32xf32> -> vector<32x32xf32>
    %c0_3 = arith.constant 0 : index
    %c0_4 = arith.constant 0 : index
    %4 = vector.load %arg3[%c0_3, %c0_4] : memref<1x32xf32, #tpu.memory_space<vmem>>, vector<1x32xf32>
    %5 = vector.broadcast %4 : vector<1x32xf32> to vector<32x32xf32>
    %6 = arith.addf %3, %5 : vector<32x32xf32>
    %c0_5 = arith.constant 0 : index
    %c0_6 = arith.constant 0 : index
    %7 = vector.load %arg4[%c0_5, %c0_6] : memref<32x32xf32, #tpu.memory_space<vmem>>, vector<32x32xf32>
    tpu.vector_store %arg4[%c0_5, %c0_6], %6 {strides = array<i32>} : memref<32x32xf32, #tpu.memory_space<vmem>>, vector<32x32xf32>,
    return
  }
  func.func @transform_0(%arg0: i32) -> (i32, i32) {
    %c0_i32 = arith.constant 0 : i32
    %c0_i32_0 = arith.constant 0 : i32
    return %arg0, %c0_i32 : i32, i32
  }
  func.func @transform_1(%arg0: i32) -> (i32, i32) {
    %c0_i32 = arith.constant 0 : i32
    %c0_i32_0 = arith.constant 0 : i32
    %c0_i32_1 = arith.constant 0 : i32
    return %c0_i32, %c0_i32_0 : i32, i32
  }
  func.func @transform_2(%arg0: i32) -> (i32, i32) {
    %c0_i32 = arith.constant 0 : i32
    %c0_i32_0 = arith.constant 0 : i32
    %c0_i32_1 = arith.constant 0 : i32
    return %c0_i32, %c0_i32_0 : i32, i32
  }
  func.func @transform_3(%arg0: i32) -> (i32, i32) {
    %c0_i32 = arith.constant 0 : i32
    %c0_i32_0 = arith.constant 0 : i32
    return %arg0, %c0_i32 : i32, i32
  }
}

</mosaic_0001>

<bundles_post_ra>
// kernel: tpu_custom_call.1
= control target key start
LH: loop header
LB: loop body
LE: loop exit
PB: predicated region body
PF: predicated region fallthrough
CT: control target
= control target key end

     0   :  { %vm43_vm0 = vcmask 1045504   ;;  %vm36_vm1 = vcmask 97280   ;;  %s201_s0 = inlined_call_operand.vmem [shape: f32[32,12], index: 0, kind: input, shape index: {}]   ;;  %s202_s1 = inlined_call_operand.vmem [shape: bf16[12,32], index: 1, kind: input, shape index: {}]   ;;  %s203_s2 = inlined_call_operand.vmem [shape: f32[1,32], index: 2, kind: input, shape index: {}]   ;;  %s204_s3 = inlined_call_operand.hbm [shape: f32[32,32], index: 3, kind: output, shape index: {}]  }
   0x1   :  { %v134_v0 = vld [vmem:[%s202_s1] sm:$0x3f]   ;;  %v17_v2 = vld [vmem:[%s201_s0 + $0x8] sm:$0xff]  ;;  %v18_v3 = vld [vmem:[%s201_s0 + $0x10] sm:$0xff] }
   0x2   :  { %v16_v1 = vld [vmem:[%s201_s0] sm:$0xff]  ;;  %130 = vmatprep.subr.msk.bf16.mxu0 %vm43_vm0, %v134_v0  ;;  %v45_v4 = vsel %vm43_vm0, %v134_v0, 0  ;;  %v19_v6 = vld [vmem:[%s201_s0 + $0x18] sm:$0xff] }
   0x3   :  { %v20_v5 = vpack.c.bf16 %v17_v2, %v16_v1 }
   0x4   :  { %8 = vsyncpa [#allocation3], 0  ;;  %125 = vmatpush3.bf16.msra.mxu0 %v45_v4  ;;  %v21_v7 = vpack.c.bf16 %v19_v6, %v18_v3  ;;  %v117_v8 = vld [vmem:[%s203_s2] ss:$0 sm:$0xff]  ;;  %vm96_vm2 = vcmask 261120   ;;  %s157_s23 = smov [#allocation2]  }
   0x5   :  { %126 = vmatprep.mubr.msk.bf16.mxu0 %vm36_vm1, %v20_v5  ;;  %s106_s24 = sshll.u32 %s157_s23, 4  ;;  %s107_s24 = int_to_ptr.vmem [resolvable:$true] %s106_s24 }
   0x6   :  { %s135_s0 = scalar_lea.vmem %s107_s24, 512  ;;  %p140_p1 = scmp.lt.s32.totalorder %s107_s24, %s107_s24 }
   0x7   :  { %127 = vmatmul.mubr.msk.bf16.vlgmr.msra.gmra.mxu0 %vm36_vm1, %v21_v7  ;;  %p136_p0 = scmp.ne.s32.totalorder %s107_s24, %s135_s0  ;;  %p141_p2 = scmp.lt.s32.totalorder %s135_s0, %s135_s0 }
   0x9   :  { %p142_p3 = por %p141_p2, %p140_p1 }
   0xb   :  { %p143_p4 = pnand %p142_p3, %p136_p0 }
  0xc7   :  { %v128_v9 = vpop.f32.mrf.mxu0 }
  0xc8   :  { %v90_v10 = vadd.f32 %v128_v9, %v117_v8 }
  0xc9   :  { %v81_v11 = vpop.f32.mrf.mxu0 }
  0xca   :  { %99 = vst.msk [vmem:[#allocation2 + $0x10] sm:$0xff] %vm96_vm2, %v90_v10  ;;  %v82_v12 = vadd.f32 %v117_v8, %v81_v11 }
  0xcb   :  { %v129_v13 = vpop.f32.mrf.mxu0 }
  0xcc   :  { %97 = vst.msk [vmem:[#allocation2] sm:$0xff] %vm96_vm2, %v82_v12  ;;  %v93_v14 = vadd.f32 %v129_v13, %v117_v8 }
  0xcd   :  { %v84_v15 = vpop.f32.mrf.mxu0 }
  0xce   :  { %100 = vst.msk [vmem:[#allocation2 + $0x18] sm:$0xff] %vm96_vm2, %v93_v14  ;;  %v85_v16 = vadd.f32 %v117_v8, %v84_v15 }
  0xd0   :  { %98 = vst.msk [vmem:[#allocation2 + $0x8] sm:$0xff] %vm96_vm2, %v85_v16 }
  0xd1   :  { %146 = shalt.err (!%p143_p4)
}
  0xd2   :  { %s158_s2 = smov 128   ;;  %s159_s25 = smov 8  }
  0xd3   :  { %112 = dma.vmem_to_hbm [thread:$0]  %s107_s24, 512, %s204_s3, [#allocation3], %s158_s2, %s158_s2, %s159_s25  }
  0xd4   :  { %155 = dma.done.wait [#allocation3], 512  }
  0xd5   :  { %156 = vsyncadd [#allocation3], 4294966784 }
  0xd6   :  { %116 = vsyncpa [#allocation3], 1 }

</bundles_post_ra>
